<compile_context>
chip_gen: v7x
topology: tpu7x:2x2x1
jax: 0.10.0
libtpu: 0.0.40
codegen_flags: <defaults>
</compile_context>

<pallas_src>
import functools

import jax
import jax.numpy as jnp
from jax import lax
from jax.experimental import pallas as pl
from jax.experimental.pallas import tpu as pltpu

F_IN = 78     # model input features
F_PAD = 128   # padded to a full lane width


def _leaky_relu(x, slope=0.2):
    # max(x, slope*x) == LeakyReLU(slope) for 0 < slope < 1 (2 VPU ops, no select).
    return jnp.maximum(x, slope * x)


def _mlp_kernel(x_ref,
                w1_ref, b1_ref,
                w2_ref, b2_ref,
                w3_ref, b3_ref,
                w4t_ref, b4_ref,
                o_ref):
    # x_ref: (batch_tile, 128) bf16 ; w*_ref bf16 ; b*_ref f32 ; o_ref (1, batch_tile) f32
    x = x_ref[...]

    h1 = jnp.dot(x, w1_ref[...], preferred_element_type=jnp.float32) + b1_ref[...]
    h1 = _leaky_relu(h1).astype(jnp.bfloat16)

    h2 = jnp.dot(h1, w2_ref[...], preferred_element_type=jnp.float32) + b2_ref[...]
    h2 = _leaky_relu(h2).astype(jnp.bfloat16)

    h3 = jnp.dot(h2, w3_ref[...], preferred_element_type=jnp.float32) + b3_ref[...]
    h3 = _leaky_relu(h3).astype(jnp.bfloat16)

    # Final layer transposed: (1, 128) contracted with h3's feature dim -> (1, batch_tile).
    # This makes the output block lane-dense (unmasked vst) instead of an N=1 column.
    h4 = lax.dot_general(w4t_ref[...], h3,
                         dimension_numbers=(((1,), (1,)), ((), ())),
                         preferred_element_type=jnp.float32)
    h4 = h4 + b4_ref[...]                          # (1,1) broadcasts over (1, batch_tile)
    o_ref[...] = (1.0 / (1.0 + jnp.exp(-h4))).astype(o_ref.dtype)   # sigmoid (exp -> EUP)


def _round_up(n, m):
    return ((n + m - 1) // m) * m


@functools.partial(jax.jit, static_argnames=("batch_tile",))
def dnn_nids_forward(x, params, batch_tile=None):
    """x: (B, 78) float32 -> (B, 1) float32."""
    (w1, b1), (w2, b2), (w3, b3), (w4, b4) = params
    B, F = x.shape
    assert F == F_IN

    if batch_tile is None:
        batch_tile = min(512, _round_up(B, 128))
    B_pad = _round_up(B, batch_tile)
    n_tiles = B_pad // batch_tile

    # Pad batch rows to a tile multiple and features 78 -> 128; cast MXU operands to bf16.
    xp = jnp.zeros((B_pad, F_PAD), jnp.bfloat16).at[:B, :F_IN].set(x.astype(jnp.bfloat16))
    w1p = jnp.zeros((F_PAD, w1.shape[1]), jnp.bfloat16).at[:F_IN, :].set(w1.astype(jnp.bfloat16))
    w2b = w2.astype(jnp.bfloat16)
    w3b = w3.astype(jnp.bfloat16)
    w4t = w4.astype(jnp.bfloat16).T                      # (1, 128): last layer transposed

    # Weights / biases: full-extent blocks with constant index_map (resident in VMEM).
    full = lambda a: pl.BlockSpec(a.shape, lambda i: (0,) * a.ndim)

    out = pl.pallas_call(
        _mlp_kernel,
        out_shape=jax.ShapeDtypeStruct((1, B_pad), jnp.float32),
        grid_spec=pltpu.PrefetchScalarGridSpec(
            num_scalar_prefetch=0,
            grid=(n_tiles,),
            in_specs=[
                pl.BlockSpec((batch_tile, F_PAD), lambda i: (i, 0)),
                full(w1p), full(b1),
                full(w2b), full(b2),
                full(w3b), full(b3),
                full(w4t), full(b4),
            ],
            out_specs=pl.BlockSpec((1, batch_tile), lambda i: (0, i)),
        ),
        compiler_params=pltpu.CompilerParams(
            dimension_semantics=("parallel",)),
    )(xp, w1p, b1, w2b, b2, w3b, b3, w4t, b4)

    # Lane-dense (1, B_pad) slab back to the module's (B, 1) layout.
    return out.reshape(B_pad, 1)[:B]


def init_params(key):
    """Deterministic init matching DNN_NIDS layer shapes.

    Weights stored as (in_features, out_features); biases as (1, out). f32 master copies."""
    dims = [(78, 128), (128, 256), (256, 128), (128, 1)]
    params = []
    for fan_in, fan_out in dims:
        key, kw, kb = jax.random.split(key, 3)
        bound = 1.0 / (fan_in ** 0.5)
        w = jax.random.uniform(kw, (fan_in, fan_out), jnp.float32, -bound, bound)
        b = jax.random.uniform(kb, (1, fan_out), jnp.float32, -bound, bound)
        params.append((w, b))
    return params


def reference_forward(x, params):
    h = x
    for i, (w, b) in enumerate(params):
        h = h @ w + b
        if i < 3:
            h = jnp.where(h > 0, h, 0.2 * h)
    return jax.nn.sigmoid(h)


if __name__ == "__main__":
    key = jax.random.PRNGKey(0)
    kx, kp = jax.random.split(key)

    B = 300  # deliberately not a multiple of the batch tile (exercises ragged tail)
    x = jax.random.normal(kx, (B, F_IN), jnp.float32)
    params = init_params(kp)

    ref = reference_forward(x, params)

    # Multi-tile path with a ragged (padded) last tile.
    out = jax.block_until_ready(dnn_nids_forward(x, params, batch_tile=128))
    assert out.shape == (B, 1)
    assert jnp.allclose(out, ref, atol=2e-2), (
        f"mismatch vs reference, max err {float(jnp.max(jnp.abs(out - ref)))}")

    # Default single-large-tile path.
    out2 = jax.block_until_ready(dnn_nids_forward(x, params))
    assert out2.shape == (B, 1)
    assert jnp.allclose(out2, ref, atol=2e-2), (
        f"mismatch vs reference (default tile), max err {float(jnp.max(jnp.abs(out2 - ref)))}")

    print("KERNEL_OK")
</pallas_src>

<mosaic_0001>
module attributes {stable_mosaic.version = 11 : i64} {
  func.func @_mlp_kernel(%arg0: i32, %arg1: memref<128x128xbf16, #tpu.memory_space<vmem>>, %arg2: memref<128x128xbf16, #tpu.memory_space<vmem>>, %arg3: memref<1x128xf32, #tpu.memory_space<vmem>>, %arg4: memref<128x256xbf16, #tpu.memory_space<vmem>>, %arg5: memref<1x256xf32, #tpu.memory_space<vmem>>, %arg6: memref<256x128xbf16, #tpu.memory_space<vmem>>, %arg7: memref<1x128xf32, #tpu.memory_space<vmem>>, %arg8: memref<1x128xbf16, #tpu.memory_space<vmem>>, %arg9: memref<1x1xf32, #tpu.memory_space<vmem>>, %arg10: memref<1x128xf32, #tpu.memory_space<vmem>>) attributes {dimension_semantics = [#tpu.dimension_semantics<parallel>], iteration_bounds = array<i64: 3>, scalar_prefetch = 0 : i64, scratch_operands = 0 : i64, tpu.core_type = #tpu.core_type<tc>, window_params = [{transform_indices = @transform_0, window_bounds = array<i64: 128, 128>}, {pipeline_mode = #tpu.pipeline_mode<synchronous>, transform_indices = @transform_1, window_bounds = array<i64: 128, 128>}, {pipeline_mode = #tpu.pipeline_mode<synchronous>, transform_indices = @transform_2, window_bounds = array<i64: 1, 128>}, {pipeline_mode = #tpu.pipeline_mode<synchronous>, transform_indices = @transform_3, window_bounds = array<i64: 128, 256>}, {pipeline_mode = #tpu.pipeline_mode<synchronous>, transform_indices = @transform_4, window_bounds = array<i64: 1, 256>}, {pipeline_mode = #tpu.pipeline_mode<synchronous>, transform_indices = @transform_5, window_bounds = array<i64: 256, 128>}, {pipeline_mode = #tpu.pipeline_mode<synchronous>, transform_indices = @transform_6, window_bounds = array<i64: 1, 128>}, {pipeline_mode = #tpu.pipeline_mode<synchronous>, transform_indices = @transform_7, window_bounds = array<i64: 1, 128>}, {pipeline_mode = #tpu.pipeline_mode<synchronous>, transform_indices = @transform_8, window_bounds = array<i64: 1, 1>}, {transform_indices = @transform_9, window_bounds = array<i64: 1, 128>}]} {
    %c0 = arith.constant 0 : index
    %c0_0 = arith.constant 0 : index
    %0 = vector.load %arg1[%c0, %c0_0] : memref<128x128xbf16, #tpu.memory_space<vmem>>, vector<128x128xbf16>
    %c0_1 = arith.constant 0 : index
    %c0_2 = arith.constant 0 : index
    %1 = vector.load %arg2[%c0_1, %c0_2] : memref<128x128xbf16, #tpu.memory_space<vmem>>, vector<128x128xbf16>
    %cst = arith.constant dense<0.000000e+00> : vector<128x128xf32>
    %2 = tpu.matmul %0, %1, %cst {dimension_numbers = #tpu.dot_dimension_numbers<[1], [0], [0], [1], [0, 0, 1, 1], [], []>} : vector<128x128xbf16>, vector<128x128xbf16>, vector<128x128xf32> -> vector<128x128xf32>
    %c0_3 = arith.constant 0 : index
    %c0_4 = arith.constant 0 : index
    %3 = vector.load %arg3[%c0_3, %c0_4] : memref<1x128xf32, #tpu.memory_space<vmem>>, vector<1x128xf32>
    %4 = vector.broadcast %3 : vector<1x128xf32> to vector<128x128xf32>
    %5 = arith.addf %2, %4 : vector<128x128xf32>
    %cst_5 = arith.constant 2.000000e-01 : f32
    %6 = vector.broadcast %cst_5 : f32 to vector<128x128xf32>
    %7 = arith.mulf %6, %5 : vector<128x128xf32>
    %8 = arith.maximumf %5, %7 : vector<128x128xf32>
    %9 = arith.truncf %8 : vector<128x128xf32> to vector<128x128xbf16>
    %c0_6 = arith.constant 0 : index
    %c0_7 = arith.constant 0 : index
    %10 = vector.load %arg4[%c0_6, %c0_7] : memref<128x256xbf16, #tpu.memory_space<vmem>>, vector<128x256xbf16>
    %cst_8 = arith.constant dense<0.000000e+00> : vector<128x256xf32>
    %11 = tpu.matmul %9, %10, %cst_8 {dimension_numbers = #tpu.dot_dimension_numbers<[1], [0], [0], [1], [0, 0, 1, 1], [], []>} : vector<128x128xbf16>, vector<128x256xbf16>, vector<128x256xf32> -> vector<128x256xf32>
    %c0_9 = arith.constant 0 : index
    %c0_10 = arith.constant 0 : index
    %12 = vector.load %arg5[%c0_9, %c0_10] : memref<1x256xf32, #tpu.memory_space<vmem>>, vector<1x256xf32>
    %13 = vector.broadcast %12 : vector<1x256xf32> to vector<128x256xf32>
    %14 = arith.addf %11, %13 : vector<128x256xf32>
    %cst_11 = arith.constant 2.000000e-01 : f32
    %15 = vector.broadcast %cst_11 : f32 to vector<128x256xf32>
    %16 = arith.mulf %15, %14 : vector<128x256xf32>
    %17 = arith.maximumf %14, %16 : vector<128x256xf32>
    %18 = arith.truncf %17 : vector<128x256xf32> to vector<128x256xbf16>
    %c0_12 = arith.constant 0 : index
    %c0_13 = arith.constant 0 : index
    %19 = vector.load %arg6[%c0_12, %c0_13] : memref<256x128xbf16, #tpu.memory_space<vmem>>, vector<256x128xbf16>
    %cst_14 = arith.constant dense<0.000000e+00> : vector<128x128xf32>
    %20 = tpu.matmul %18, %19, %cst_14 {dimension_numbers = #tpu.dot_dimension_numbers<[1], [0], [0], [1], [0, 0, 1, 1], [], []>} : vector<128x256xbf16>, vector<256x128xbf16>, vector<128x128xf32> -> vector<128x128xf32>
    %c0_15 = arith.constant 0 : index
    %c0_16 = arith.constant 0 : index
    %21 = vector.load %arg7[%c0_15, %c0_16] : memref<1x128xf32, #tpu.memory_space<vmem>>, vector<1x128xf32>
    %22 = vector.broadcast %21 : vector<1x128xf32> to vector<128x128xf32>
    %23 = arith.addf %20, %22 : vector<128x128xf32>
    %cst_17 = arith.constant 2.000000e-01 : f32
    %24 = vector.broadcast %cst_17 : f32 to vector<128x128xf32>
    %25 = arith.mulf %24, %23 : vector<128x128xf32>
    %26 = arith.maximumf %23, %25 : vector<128x128xf32>
    %27 = arith.truncf %26 : vector<128x128xf32> to vector<128x128xbf16>
    %c0_18 = arith.constant 0 : index
    %c0_19 = arith.constant 0 : index
    %28 = vector.load %arg8[%c0_18, %c0_19] : memref<1x128xbf16, #tpu.memory_space<vmem>>, vector<1x128xbf16>
    %cst_20 = arith.constant dense<0.000000e+00> : vector<1x128xf32>
    %29 = tpu.matmul %28, %27, %cst_20 {dimension_numbers = #tpu.dot_dimension_numbers<[1], [1], [0], [0], [0, 0, 1, 0], [], []>} : vector<1x128xbf16>, vector<128x128xbf16>, vector<1x128xf32> -> vector<1x128xf32>
    %c0_21 = arith.constant 0 : index
    %c0_22 = arith.constant 0 : index
    %30 = vector.load %arg9[%c0_21, %c0_22] : memref<1x1xf32, #tpu.memory_space<vmem>>, vector<1x1xf32>
    %31 = vector.broadcast %30 : vector<1x1xf32> to vector<1x128xf32>
    %32 = arith.addf %29, %31 : vector<1x128xf32>
    %cst_23 = arith.constant 0.000000e+00 : f32
    %33 = vector.broadcast %cst_23 : f32 to vector<1x128xf32>
    %34 = arith.subf %33, %32 : vector<1x128xf32>
    %35 = math.exp %34 : vector<1x128xf32>
    %cst_24 = arith.constant 1.000000e+00 : f32
    %36 = vector.broadcast %cst_24 : f32 to vector<1x128xf32>
    %37 = arith.addf %36, %35 : vector<1x128xf32>
    %cst_25 = arith.constant 1.000000e+00 : f32
    %38 = vector.broadcast %cst_25 : f32 to vector<1x128xf32>
    %39 = arith.divf %38, %37 : vector<1x128xf32>
    %c0_26 = arith.constant 0 : index
    %c0_27 = arith.constant 0 : index
    %40 = vector.load %arg10[%c0_26, %c0_27] : memref<1x128xf32, #tpu.memory_space<vmem>>, vector<1x128xf32>
    tpu.vector_store %arg10[%c0_26, %c0_27], %39 {strides = array<i32>} : memref<1x128xf32, #tpu.memory_space<vmem>>, vector<1x128xf32>,
    return
  }
  func.func @transform_0(%arg0: i32) -> (i32, i32) {
    %c0_i32 = arith.constant 0 : i32
    %c0_i32_0 = arith.constant 0 : i32
    return %arg0, %c0_i32 : i32, i32
  }
  func.func @transform_1(%arg0: i32) -> (i32, i32) {
    %c0_i32 = arith.constant 0 : i32
    %c0_i32_0 = arith.constant 0 : i32
    %c0_i32_1 = arith.constant 0 : i32
    return %c0_i32, %c0_i32_0 : i32, i32
  }
  func.func @transform_2(%arg0: i32) -> (i32, i32) {
    %c0_i32 = arith.constant 0 : i32
    %c0_i32_0 = arith.constant 0 : i32
    %c0_i32_1 = arith.constant 0 : i32
    return %c0_i32, %c0_i32_0 : i32, i32
  }
  func.func @transform_3(%arg0: i32) -> (i32, i32) {
    %c0_i32 = arith.constant 0 : i32
    %c0_i32_0 = arith.constant 0 : i32
    %c0_i32_1 = arith.constant 0 : i32
    return %c0_i32, %c0_i32_0 : i32, i32
  }
  func.func @transform_4(%arg0: i32) -> (i32, i32) {
    %c0_i32 = arith.constant 0 : i32
    %c0_i32_0 = arith.constant 0 : i32
    %c0_i32_1 = arith.constant 0 : i32
    return %c0_i32, %c0_i32_0 : i32, i32
  }
  func.func @transform_5(%arg0: i32) -> (i32, i32) {
    %c0_i32 = arith.constant 0 : i32
    %c0_i32_0 = arith.constant 0 : i32
    %c0_i32_1 = arith.constant 0 : i32
    return %c0_i32, %c0_i32_0 : i32, i32
  }
  func.func @transform_6(%arg0: i32) -> (i32, i32) {
    %c0_i32 = arith.constant 0 : i32
    %c0_i32_0 = arith.constant 0 : i32
    %c0_i32_1 = arith.constant 0 : i32
    return %c0_i32, %c0_i32_0 : i32, i32
  }
  func.func @transform_7(%arg0: i32) -> (i32, i32) {
    %c0_i32 = arith.constant 0 : i32
    %c0_i32_0 = arith.constant 0 : i32
    %c0_i32_1 = arith.constant 0 : i32
    return %c0_i32, %c0_i32_0 : i32, i32
  }
  func.func @transform_8(%arg0: i32) -> (i32, i32) {
    %c0_i32 = arith.constant 0 : i32
    %c0_i32_0 = arith.constant 0 : i32
    %c0_i32_1 = arith.constant 0 : i32
    return %c0_i32, %c0_i32_0 : i32, i32
  }
  func.func @transform_9(%arg0: i32) -> (i32, i32) {
    %c0_i32 = arith.constant 0 : i32
    %c0_i32_0 = arith.constant 0 : i32
    return %c0_i32, %arg0 : i32, i32
  }
}

</mosaic_0001>

<bundles_post_ra>
// kernel: dnn_nids_forward.1
= control target key start
LH: loop header
LB: loop body
LE: loop exit
PB: predicated region body
PF: predicated region fallthrough
CT: control target
= control target key end

     0   :  { %s1620_s11 = smov 0   ;;  %s1882_s0 = inlined_call_operand.vmem [shape: bf16[384,128], index: 0, kind: input, shape index: {}]   ;;  %s1883_s1 = inlined_call_operand.vmem [shape: bf16[128,128], index: 1, kind: input, shape index: {}]   ;;  %s1884_s2 = inlined_call_operand.vmem [shape: f32[1,128], index: 2, kind: input, shape index: {}]   ;;  %s1885_s3 = inlined_call_operand.vmem [shape: bf16[128,256], index: 3, kind: input, shape index: {}]   ;;  %s1886_s4 = inlined_call_operand.vmem [shape: f32[1,256], index: 4, kind: input, shape index: {}]   ;;  %s1887_s5 = inlined_call_operand.vmem [shape: bf16[256,128], index: 5, kind: input, shape index: {}]   ;;  %s1888_s6 = inlined_call_operand.vmem [shape: f32[1,128], index: 6, kind: input, shape index: {}]   ;;  %s1889_s7 = inlined_call_operand.vmem [shape: bf16[1,128], index: 7, kind: input, shape index: {}]   ;;  %s1890_s8 = inlined_call_operand.<no memory space> [shape: f32[1,1], index: 8, kind: input, shape index: {}]   ;;  %s1891_s9 = inlined_call_operand.vmem [shape: f32[1,384], index: 9, kind: output, shape index: {}]  }
   0x1   :  { %v14_v0 = vstv %s1890_s8 }
   0x2   :  { %15 = vst [vmem:[#allocation2] sm:$0x1] %v14_v0 }
   0x3 LB: > { %s1626_s12 = sadd.s32 4294967295, %s1562_s11   ;;  %p1288_p0 = scmp.ge.s32.totalorder %s1562_s11, 1  ;;  %s1562_s11 = sphi %s1620_s11, %s21_s11  }
   0x4   : > { %p290_p1 = scmp.lt.s32.totalorder %s1562_s11, 4 }
   0x6   : > { %p291_p2 = pnand %p1288_p0, %p290_p1 }
   0x7   : > { %v1496_v1 = vld [vmem:[%s1883_s1] sm:$0xff] (!%p291_p2)   ;;  %s1289_s8 = sshll.u32 (!%p291_p2), %s1626_s12, 4  ;;  %v1497_v2 = vld [vmem:[%s1883_s1 + $0x8] sm:$0xff] (!%p291_p2)   ;;  %v1498_v3 = vld [vmem:[%s1883_s1 + $0x10] sm:$0xff] (!%p291_p2)   ;;  %v1564_v33 = vmov (!%p291_p2), 0   ;;  %vm1566_vm0 = vmmov (!%p291_p2), 0  }
   0x8   : > { %294 = sbr.rel (%p291_p2) target bundleno = 1018 (0x3fa), region = 56  ;;  %p325_p3 = scmp.lt.s32.totalorder (!%p291_p2), %s1289_s8, 47  ;;  %1432 = vmatprep.subr.bf16.mxu0 (!%p291_p2), %v1496_v1  ;;  %v1499_v4 = vld [vmem:[%s1883_s1 + $0x18] sm:$0xff] (!%p291_p2)   ;;  %v1500_v6 = vld [vmem:[%s1883_s1 + $0x20] sm:$0xff] (!%p291_p2)   ;;  %v1501_v7 = vld [vmem:[%s1883_s1 + $0x28] sm:$0xff] (!%p291_p2)   ;;  %746 = vmatprep.mubr.bf16.mxu1 (!%p291_p2), %v1564_v33 }
   0x9   : > { %1433 = vmatpush3.bf16.msra.mxu0 (!%p291_p2), %v1496_v1  ;;  %v1512_v8 = vld [vmem:[%s1885_s3 + $0x4] ss:$8 sps:$4 sm:$0xff] (!%p291_p2)   ;;  %v1514_v9 = vld [vmem:[%s1885_s3] ss:$8 sps:$4 sm:$0xff] (!%p291_p2)   ;;  %v1515_v10 = vld [vmem:[%s1885_s3 + $0x14] ss:$8 sps:$4 sm:$0xff] (!%p291_p2)   ;;  %1495 = vset.pattern.permute.xlu0 (!%p291_p2), %v1564_v33 }
   0xa   : > { %1434 = vmatprep.subr.bf16.mxu0 (!%p291_p2), %v1497_v2  ;;  %714 = vmatprep.subr.bf16.mxu1 (!%p291_p2), %v1512_v8  ;;  %v1502_v11 = vld [vmem:[%s1883_s1 + $0x30] sm:$0xff] (!%p291_p2)   ;;  %v1518_v13 = vld [vmem:[%s1885_s3 + $0x24] ss:$8 sps:$4 sm:$0xff] (!%p291_p2)   ;;  %v1503_v14 = vld [vmem:[%s1883_s1 + $0x38] sm:$0xff] (!%p291_p2)   ;;  %p330_p4 = scmp.lt.s32.totalorder (!%p291_p2), %s1626_s12, 2 }
   0xb   : > { %715 = vmatpush1.bf16.msra.mxu1 (!%p291_p2), %v1514_v9  ;;  %v1517_v12 = vld [vmem:[%s1885_s3 + $0x10] ss:$8 sps:$4 sm:$0xff] (!%p291_p2)   ;;  %v1520_v15 = vld [vmem:[%s1885_s3 + $0x20] ss:$8 sps:$4 sm:$0xff] (!%p291_p2)   ;;  %v1521_v16 = vld [vmem:[%s1885_s3 + $0x34] ss:$8 sps:$4 sm:$0xff] (!%p291_p2)  }
   0xc   : > { %716 = vmatprep.subr.bf16.mxu1 (!%p291_p2), %v1515_v10  ;;  %v1523_v17 = vld [vmem:[%s1885_s3 + $0x30] ss:$8 sps:$4 sm:$0xff] (!%p291_p2)   ;;  %v1524_v18 = vld [vmem:[%s1885_s3 + $0x44] ss:$8 sps:$4 sm:$0xff] (!%p291_p2)   ;;  %v1526_v21 = vld [vmem:[%s1885_s3 + $0x40] ss:$8 sps:$4 sm:$0xff] (!%p291_p2)  }
   0xd   : > { %1435 = vmatpush3.bf16.msra.mxu0 (!%p291_p2), %v1497_v2  ;;  %v1527_v27 = vld [vmem:[%s1885_s3 + $0x54] ss:$8 sps:$4 sm:$0xff] (!%p291_p2)   ;;  %v1529_v28 = vld [vmem:[%s1885_s3 + $0x50] ss:$8 sps:$4 sm:$0xff] (!%p291_p2)   ;;  %v1530_v29 = vld [vmem:[%s1885_s3 + $0x64] ss:$8 sps:$4 sm:$0xff] (!%p291_p2)  }
   0xe   : > { %1436 = vmatprep.subr.bf16.mxu0 (!%p291_p2), %v1498_v3  ;;  %v1532_v30 = vld [vmem:[%s1885_s3 + $0x60] ss:$8 sps:$4 sm:$0xff] (!%p291_p2)   ;;  %v1533_v31 = vld [vmem:[%s1885_s3 + $0x74] ss:$8 sps:$4 sm:$0xff] (!%p291_p2)   ;;  %v1535_v32 = vld [vmem:[%s1885_s3 + $0x70] ss:$8 sps:$4 sm:$0xff] (!%p291_p2)  }
   0xf   : > { %s1893_s8 = smov (!%p325_p3, %s1289_s8), 47  ;;  %717 = vmatpush1.bf16.msra.mxu1 %v1517_v12  ;;  %v1536_v34 = vld [vmem:[%s1887_s5 + $0x40] sm:$0xff]   ;;  %v1538_v36 = vld [vmem:[%s1887_s5 + $0x48] sm:$0xff]   ;;  %v1540_v38 = vld [vmem:[%s1887_s5 + $0x50] sm:$0xff]   ;;  %s1895_s12 = smov (!%p330_p4, %s1626_s12), 2 }
  0x10   : > { %s1290_s19 = sshll.u32 %s1893_s8, 2  ;;  %718 = vmatprep.subr.bf16.mxu1 %v1518_v13  ;;  %v1537_v35 = vld [vmem:[%s1887_s5] sm:$0xff]   ;;  %v1539_v37 = vld [vmem:[%s1887_s5 + $0x8] sm:$0xff]   ;;  %v1541_v39 = vld [vmem:[%s1887_s5 + $0x10] sm:$0xff]   ;;  %s332_s28 = scalar_lea.vmem %s1891_s9, %s1895_s12 }
  0x11   : > { %s1643_s22 = scalar_lea.vmem %s1882_s0, %s1290_s19  ;;  %1437 = vmatpush3.bf16.msra.mxu0 %v1498_v3  ;;  %v1542_v40 = vld [vmem:[%s1887_s5 + $0x58] sm:$0xff]   ;;  %v1544_v42 = vld [vmem:[%s1887_s5 + $0x60] sm:$0xff]  }
  0x12   : > { %v1504_v5 = vld [vmem:[%s1643_s22] sm:$0xff]   ;;  %1438 = vmatprep.subr.bf16.mxu0 %v1499_v4  ;;  %v1505_v19 = vld [vmem:[%s1643_s22 + $0x8] sm:$0xff]   ;;  %v1506_v20 = vld [vmem:[%s1643_s22 + $0x10] sm:$0xff]  }
  0x13   : > { %1448 = vmatprep.mubr.bf16.mxu0 %v1504_v5  ;;  %719 = vmatpush1.bf16.msra.mxu1 %v1520_v15  ;;  %v1507_v22 = vld [vmem:[%s1643_s22 + $0x18] sm:$0xff]   ;;  %v1508_v23 = vld [vmem:[%s1643_s22 + $0x20] sm:$0xff]   ;;  %v1509_v24 = vld [vmem:[%s1643_s22 + $0x28] sm:$0xff]  }
  0x14   : > { %720 = vmatprep.subr.bf16.mxu1 %v1521_v16  ;;  %v1510_v25 = vld [vmem:[%s1643_s22 + $0x30] sm:$0xff]   ;;  %v1511_v26 = vld [vmem:[%s1643_s22 + $0x38] sm:$0xff]   ;;  %v1545_v43 = vld [vmem:[%s1887_s5 + $0x20] sm:$0xff]  }
  0x15   : > { %1439 = vmatpush3.bf16.msra.mxu0 %v1499_v4  ;;  %v1543_v41 = vld [vmem:[%s1887_s5 + $0x18] sm:$0xff]   ;;  %v1751_v44 = vld [vmem:[%s1884_s2] ss:$0 sm:$0xff] }
  0x16   : > { %1440 = vmatprep.subr.bf16.mxu0 %v1500_v6 }
  0x17   : > { %721 = vmatpush1.bf16.msra.mxu1 %v1523_v17 }
  0x18   : > { %722 = vmatprep.subr.bf16.mxu1 %v1524_v18 }
  0x19   : > { %1441 = vmatpush3.bf16.msra.mxu0 %v1500_v6 }
  0x1a   : > { %1442 = vmatprep.subr.bf16.mxu0 %v1501_v7 }
  0x1b   : > { %723 = vmatpush1.bf16.msra.mxu1 %v1526_v21 }
  0x1c   : > { %724 = vmatprep.subr.bf16.mxu1 %v1527_v27 }
  0x1d   : > { %1443 = vmatpush3.bf16.msra.mxu0 %v1501_v7 }
  0x1e   : > { %1444 = vmatprep.subr.bf16.mxu0 %v1502_v11 }
  0x1f   : > { %725 = vmatpush1.bf16.msra.mxu1 %v1529_v28 }
  0x20   : > { %726 = vmatprep.subr.bf16.mxu1 %v1530_v29 }
  0x21   : > { %1445 = vmatpush3.bf16.msra.mxu0 %v1502_v11 }
  0x22   : > { %1446 = vmatprep.subr.bf16.mxu0 %v1503_v14 }
  0x23   : > { %727 = vmatpush1.bf16.msra.mxu1 %v1532_v30 }
  0x24   : > { %728 = vmatprep.subr.bf16.mxu1 %v1533_v31 }
  0x25   : > { %1447 = vmatpush3.bf16.msra.mxu0 %v1503_v14 }
  0x26   : > { %1359 = vmatprep.subr.bf16.mxu0 %v1536_v34 }
  0x27   : > { %729 = vmatpush1.bf16.msra.mxu1 %v1535_v32 }
  0x28   : > { %1449 = vmatmul.mubr.bf16.vlgmr.msra.gmra.mrb[0].mxu0 %v1505_v19 }
  0x29   : > { %1452 = vmatprep.mubr.bf16.mxu0 %v1506_v20  ;;  %1360 = vmatpush3.bf16.msra.mxu0 %v1537_v35 }
  0x2a   : > { %1361 = vmatprep.subr.bf16.mxu0 %v1538_v36 }
  0x2d   : > { %1362 = vmatpush3.bf16.msra.mxu0 %v1539_v37 }
  0x2e   : > { %1363 = vmatprep.subr.bf16.mxu0 %v1540_v38 }
  0x30   : > { %1453 = vmatmul.mubr.bf16.gmra.mrb[4].mxu0 %v1507_v22 }
  0x31   : > { %1456 = vmatprep.mubr.bf16.mxu0 %v1508_v23  ;;  %1364 = vmatpush3.bf16.msra.mxu0 %v1541_v39 }
  0x32   : > { %1365 = vmatprep.subr.bf16.mxu0 %v1542_v40 }
  0x35   : > { %1366 = vmatpush3.bf16.msra.mxu0 %v1543_v41 }
  0x36   : > { %1367 = vmatprep.subr.bf16.mxu0 %v1544_v42 }
  0x38   : > { %1457 = vmatmul.mubr.bf16.gmra.mrb[8].mxu0 %v1509_v24 }
  0x39   : > { %1460 = vmatprep.mubr.bf16.mxu0 %v1510_v25  ;;  %1368 = vmatpush3.bf16.msra.mxu0 %v1545_v43 }
  0x40   : > { %1461 = vmatmul.mubr.bf16.gmra.mrb[12].mxu0 %v1511_v26 }
  0xfb   : > { %v1450_v45 = vpop.f32.mrb[0].mxu0 }
  0xfc   : > { %v512_v46 = vadd.f32 %v1450_v45, %v1751_v44  ;;  %v503_v47 = vpop.f32.mrb[1].mxu0 }
  0xfd   : > { %v504_v48 = vadd.f32 %v1751_v44, %v503_v47  ;;  %v1451_v49 = vpop.f32.mrb[2].mxu0 }
  0xfe   : > { %v568_v50 = vmul.f32 0.2, %v512_v46  ;;  %v515_v51 = vadd.f32 %v1451_v49, %v1751_v44  ;;  %v506_v52 = vpop.f32.mrb[3].mxu0 }
  0xff   : > { %v566_v53 = vmul.f32 0.2, %v504_v48  ;;  %v507_v54 = vadd.f32 %v1751_v44, %v506_v52 }
 0x100   : > { %v569_v55 = vmul.f32 0.2, %v515_v51  ;;  %v584_v57 = vmax.f32 %v512_v46, %v568_v50 }
 0x101   : > { %v567_v56 = vmul.f32 0.2, %v507_v54  ;;  %v582_v59 = vmax.f32 %v504_v48, %v566_v53 }
 0x102   : > { %v585_v58 = vmax.f32 %v515_v51, %v569_v55  ;;  %v1547_v55 = vld [vmem:[%s1887_s5 + $0x28] sm:$0xff]  }
 0x103   : > { %v583_v60 = vmax.f32 %v507_v54, %v567_v56  ;;  %v1454_v61 = vpop.f32.mrb[4].mxu0  ;;  %v1548_v56 = vld [vmem:[%s1887_s5 + $0x70] sm:$0xff]  }
 0x104   : > { %v528_v62 = vadd.f32 %v1454_v61, %v1751_v44  ;;  %v519_v63 = vpop.f32.mrb[5].mxu0  ;;  %v599_v0 = vpack.c.bf16 %v585_v58, %v584_v57  ;;  %v1549_v57 = vld [vmem:[%s1887_s5 + $0x30] sm:$0xff]   ;;  %v1551_v58 = vld [vmem:[%s1887_s5 + $0x38] sm:$0xff]  }
 0x105   : > { %v520_v1 = vadd.f32 %v1751_v44, %v519_v63  ;;  %v598_v2 = vpack.c.bf16 %v583_v60, %v582_v59  ;;  %v1455_v3 = vpop.f32.mrb[6].mxu0  ;;  %v624_v59 = vlaneseq }
 0x106   : > { %v572_v4 = vmul.f32 0.2, %v528_v62  ;;  %v531_v5 = vadd.f32 %v1455_v3, %v1751_v44  ;;  %v522_v6 = vpop.f32.mrb[7].mxu0 }
 0x107   : > { %v570_v7 = vmul.f32 0.2, %v520_v1  ;;  %747 = vmatmul.mubr.bf16.vlgmr.msra.gmra.mrb[0].mxu1 %v598_v2  ;;  %v523_v8 = vadd.f32 %v1751_v44, %v522_v6  ;;  %v1794_v60 = vshrl.u32 %v624_v59, 7 }
 0x108   : > { %v588_v9 = vmax.f32 %v528_v62, %v572_v4  ;;  %v573_v10 = vmul.f32 0.2, %v531_v5  ;;  %756 = vmatprep.mubr.bf16.mxu1 %v1564_v33  ;;  %v622_v62 = vld [vmem:[%s1886_s4] sm:$0x3] }
 0x109   : > { %v586_v11 = vmax.f32 %v520_v1, %v570_v7  ;;  %v571_v12 = vmul.f32 0.2, %v523_v8  ;;  %v626_v61 = vsub.s32 0, %v1794_v60  ;;  %v630_v63 = vsub.s32 1, %v1794_v60 }
 0x10a   : > { %v589_v13 = vmax.f32 %v531_v5, %v573_v10 }
 0x10b   : > { %v587_v14 = vmax.f32 %v523_v8, %v571_v12  ;;  %v1458_v15 = vpop.f32.mrb[8].mxu0  ;;  %v1805_v1 = vrot.slane %v622_v62, %v630_v63 }
 0x10c   : > { %v544_v16 = vadd.f32 %v1458_v15, %v1751_v44  ;;  %v535_v17 = vpop.f32.mrb[9].mxu0  ;;  %v601_v18 = vpack.c.bf16 %v589_v13, %v588_v9 }
 0x10d   : > { %v536_v19 = vadd.f32 %v1751_v44, %v535_v17  ;;  %v600_v20 = vpack.c.bf16 %v587_v14, %v586_v11  ;;  %v1459_v21 = vpop.f32.mrb[10].mxu0 }
 0x10e   : > { %v576_v22 = vmul.f32 0.2, %v544_v16  ;;  %v547_v23 = vadd.f32 %v1459_v21, %v1751_v44  ;;  %v538_v24 = vpop.f32.mrb[11].mxu0 }
 0x10f   : > { %757 = vmatmul.mubr.bf16.gmra.mrb[4].mxu1 %v599_v0  ;;  %v574_v25 = vmul.f32 0.2, %v536_v19  ;;  %v539_v26 = vadd.f32 %v1751_v44, %v538_v24  ;;  %v1803_v0 = vrot.slane %v622_v62, %v626_v61 }
 0x110   : > { %v592_v27 = vmax.f32 %v544_v16, %v576_v22  ;;  %766 = vmatprep.mubr.bf16.mxu1 %v1564_v33  ;;  %v577_v28 = vmul.f32 0.2, %v547_v23 }
 0x111   : > { %v590_v29 = vmax.f32 %v536_v19, %v574_v25  ;;  %v575_v30 = vmul.f32 0.2, %v539_v26 }
 0x112   : > { %v593_v31 = vmax.f32 %v547_v23, %v577_v28 }
 0x113   : > { %v591_v32 = vmax.f32 %v539_v26, %v575_v30  ;;  %v1462_v34 = vpop.f32.mrb[12].mxu0 }
 0x114   : > { %v560_v35 = vadd.f32 %v1462_v34, %v1751_v44  ;;  %v551_v36 = vpop.f32.mrb[13].mxu0  ;;  %v603_v37 = vpack.c.bf16 %v593_v31, %v592_v27 }
 0x115   : > { %v552_v38 = vadd.f32 %v1751_v44, %v551_v36  ;;  %v602_v39 = vpack.c.bf16 %v591_v32, %v590_v29  ;;  %v1463_v40 = vpop.f32.mrb[14].mxu0 }
 0x116   : > { %v580_v41 = vmul.f32 0.2, %v560_v35  ;;  %v563_v42 = vadd.f32 %v1463_v40, %v1751_v44  ;;  %v554_v43 = vpop.f32.mrb[15].mxu0 }
 0x117   : > { %767 = vmatmul.mubr.bf16.gmra.mrb[8].mxu1 %v600_v20  ;;  %v578_v45 = vmul.f32 0.2, %v552_v38  ;;  %v555_v46 = vadd.f32 %v1751_v44, %v554_v43  ;;  %v1546_v44 = vld [vmem:[%s1887_s5 + $0x68] sm:$0xff]  }
 0x118   : > { %776 = vmatprep.mubr.bf16.mxu1 %v1564_v33  ;;  %v596_v47 = vmax.f32 %v560_v35, %v580_v41  ;;  %v581_v48 = vmul.f32 0.2, %v563_v42  ;;  %1369 = vmatprep.subr.bf16.mxu0 %v1546_v44 }
 0x119   : > { %v594_v49 = vmax.f32 %v552_v38, %v578_v45  ;;  %v579_v50 = vmul.f32 0.2, %v555_v46  ;;  %1370 = vmatpush3.bf16.msra.mxu0 %v1547_v55 }
 0x11a   : > { %v597_v51 = vmax.f32 %v563_v42, %v581_v48  ;;  %1371 = vmatprep.subr.bf16.mxu0 %v1548_v56 }
 0x11b   : > { %v595_v52 = vmax.f32 %v555_v46, %v579_v50 }
 0x11c   : > { %v605_v53 = vpack.c.bf16 %v597_v51, %v596_v47 }
 0x11d   : > { %v604_v54 = vpack.c.bf16 %v595_v52, %v594_v49  ;;  %1372 = vmatpush3.bf16.msra.mxu0 %v1549_v57 }
 0x11f   : > { %777 = vmatmul.mubr.bf16.gmra.mrb[12].mxu1 %v601_v18 }
 0x120   : > { %786 = vmatprep.mubr.bf16.mxu1 %v1564_v33 }
 0x127   : > { %787 = vmatmul.mubr.bf16.gmra.mrb[16].mxu1 %v602_v39 }
 0x128   : > { %796 = vmatprep.mubr.bf16.mxu1 %v1564_v33 }
 0x12f   : > { %797 = vmatmul.mubr.bf16.gmra.mrb[20].mxu1 %v603_v37 }
 0x130   : > { %806 = vmatprep.mubr.bf16.mxu1 %v1564_v33 }
 0x137   : > { %807 = vmatmul.mubr.bf16.gmra.mrb[24].mxu1 %v604_v54 }
 0x138   : > { %816 = vmatprep.mubr.bf16.mxu1 %v1564_v33  ;;  %v1550_v33 = vld [vmem:[%s1887_s5 + $0x78] sm:$0xff]  }
 0x139   : > { %1373 = vmatprep.subr.bf16.mxu0 %v1550_v33 }
 0x13a   : > { %1374 = vmatpush3.bf16.msra.mxu0 %v1551_v58 }
 0x13f   : > { %817 = vmatmul.mubr.bf16.gmra.mrb[28].mxu1 %v605_v53 }
 0x1da   : > { %v748_v2 = vpop.f32.mrb[0].mxu1 }
 0x1db   : > { %v749_v3 = vadd.f32 %v748_v2, %v1803_v0  ;;  %v750_v4 = vpop.f32.mrb[1].mxu1 }
 0x1dc   : > { %v751_v5 = vadd.f32 %v750_v4, %v1805_v1  ;;  %v752_v6 = vpop.f32.mrb[2].mxu1 }
 0x1dd   : > { %v827_v7 = vmul.f32 0.2, %v749_v3  ;;  %v753_v8 = vadd.f32 %v752_v6, %v1803_v0  ;;  %v754_v9 = vpop.f32.mrb[3].mxu1 }
 0x1de   : > { %v828_v10 = vmul.f32 0.2, %v751_v5  ;;  %v755_v11 = vadd.f32 %v754_v9, %v1805_v1 }
 0x1df   : > { %v829_v12 = vmul.f32 0.2, %v753_v8  ;;  %v859_v14 = vmax.f32 %v749_v3, %v827_v7 }
 0x1e0   : > { %v830_v13 = vmul.f32 0.2, %v755_v11  ;;  %v860_v16 = vmax.f32 %v751_v5, %v828_v10 }
 0x1e1   : > { %v861_v15 = vmax.f32 %v753_v8, %v829_v12 }
 0x1e2   : > { %v862_v17 = vmax.f32 %v755_v11, %v830_v13  ;;  %v758_v18 = vpop.f32.mrb[4].mxu1 }
 0x1e3   : > { %v891_v19 = vpack.c.bf16 %v861_v15, %v859_v14  ;;  %v759_v20 = vadd.f32 %v758_v18, %v1803_v0  ;;  %v760_v21 = vpop.f32.mrb[5].mxu1 }
 0x1e4   : > { %v761_v22 = vadd.f32 %v760_v21, %v1805_v1  ;;  %v762_v23 = vpop.f32.mrb[6].mxu1  ;;  %v892_v24 = vpack.c.bf16 %v862_v17, %v860_v16 }
 0x1e5   : > { %v831_v25 = vmul.f32 0.2, %v759_v20  ;;  %v763_v26 = vadd.f32 %v762_v23, %v1803_v0  ;;  %v764_v27 = vpop.f32.mrb[7].mxu1 }
 0x1e6   : > { %v832_v28 = vmul.f32 0.2, %v761_v22  ;;  %v765_v29 = vadd.f32 %v764_v27, %v1805_v1  ;;  %1074 = vmatprep.mubr.bf16.mxu0 %v892_v24 }
 0x1e7   : > { %v833_v30 = vmul.f32 0.2, %v763_v26  ;;  %1075 = vmatmul.mubr.bf16.vlgmr.msra.gmra.mrb[16].mxu0 %v891_v19  ;;  %v863_v32 = vmax.f32 %v759_v20, %v831_v25 }
 0x1e8   : > { %v834_v31 = vmul.f32 0.2, %v765_v29  ;;  %v864_v35 = vmax.f32 %v761_v22, %v832_v28 }
 0x1e9   : > { %v865_v34 = vmax.f32 %v763_v26, %v833_v30 }
 0x1ea   : > { %v866_v36 = vmax.f32 %v765_v29, %v834_v31  ;;  %v768_v37 = vpop.f32.mrb[8].mxu1 }
 0x1eb   : > { %v769_v38 = vadd.f32 %v768_v37, %v1803_v0  ;;  %v770_v39 = vpop.f32.mrb[9].mxu1  ;;  %v893_v40 = vpack.c.bf16 %v865_v34, %v863_v32 }
 0x1ec   : > { %v771_v41 = vadd.f32 %v770_v39, %v1805_v1  ;;  %v772_v42 = vpop.f32.mrb[10].mxu1  ;;  %v894_v43 = vpack.c.bf16 %v866_v36, %v864_v35 }
 0x1ed   : > { %v835_v45 = vmul.f32 0.2, %v769_v38  ;;  %v773_v46 = vadd.f32 %v772_v42, %v1803_v0  ;;  %v774_v47 = vpop.f32.mrb[11].mxu1 }
 0x1ee   : > { %v836_v48 = vmul.f32 0.2, %v771_v41  ;;  %v775_v49 = vadd.f32 %v774_v47, %v1805_v1  ;;  %1082 = vmatprep.mubr.bf16.mxu0 %v894_v43 }
 0x1ef   : > { %v837_v50 = vmul.f32 0.2, %v773_v46  ;;  %1083 = vmatmul.mubr.bf16.gmra.mrb[20].mxu0 %v893_v40  ;;  %v867_v52 = vmax.f32 %v769_v38, %v835_v45 }
 0x1f0   : > { %v838_v51 = vmul.f32 0.2, %v775_v49  ;;  %v868_v54 = vmax.f32 %v771_v41, %v836_v48 }
 0x1f1   : > { %v869_v53 = vmax.f32 %v773_v46, %v837_v50 }
 0x1f2   : > { %v870_v44 = vmax.f32 %v775_v49, %v838_v51  ;;  %v778_v55 = vpop.f32.mrb[12].mxu1 }
 0x1f3   : > { %v779_v56 = vadd.f32 %v778_v55, %v1803_v0  ;;  %v780_v57 = vpop.f32.mrb[13].mxu1  ;;  %v895_v33 = vpack.c.bf16 %v869_v53, %v867_v52 }
 0x1f4   : > { %v781_v58 = vadd.f32 %v780_v57, %v1805_v1  ;;  %v782_v59 = vpop.f32.mrb[14].mxu1  ;;  %v896_v62 = vpack.c.bf16 %v870_v44, %v868_v54 }
 0x1f5   : > { %v839_v63 = vmul.f32 0.2, %v779_v56  ;;  %v783_v2 = vadd.f32 %v782_v59, %v1803_v0  ;;  %v784_v3 = vpop.f32.mrb[15].mxu1 }
 0x1f6   : > { %v840_v4 = vmul.f32 0.2, %v781_v58  ;;  %v785_v5 = vadd.f32 %v784_v3, %v1805_v1  ;;  %1090 = vmatprep.mubr.bf16.mxu0 %v896_v62 }
 0x1f7   : > { %v841_v6 = vmul.f32 0.2, %v783_v2  ;;  %1091 = vmatmul.mubr.bf16.gmra.mrb[24].mxu0 %v895_v33  ;;  %v871_v8 = vmax.f32 %v779_v56, %v839_v63 }
 0x1f8   : > { %v842_v7 = vmul.f32 0.2, %v785_v5  ;;  %v872_v10 = vmax.f32 %v781_v58, %v840_v4 }
 0x1f9   : > { %v873_v9 = vmax.f32 %v783_v2, %v841_v6 }
 0x1fa   : > { %v874_v11 = vmax.f32 %v785_v5, %v842_v7  ;;  %v788_v12 = vpop.f32.mrb[16].mxu1 }
 0x1fb   : > { %v789_v13 = vadd.f32 %v788_v12, %v1803_v0  ;;  %v790_v14 = vpop.f32.mrb[17].mxu1  ;;  %v897_v15 = vpack.c.bf16 %v873_v9, %v871_v8 }
 0x1fc   : > { %v791_v16 = vadd.f32 %v790_v14, %v1805_v1  ;;  %v792_v17 = vpop.f32.mrb[18].mxu1  ;;  %v898_v18 = vpack.c.bf16 %v874_v11, %v872_v10 }
 0x1fd   : > { %v843_v19 = vmul.f32 0.2, %v789_v13  ;;  %v793_v20 = vadd.f32 %v792_v17, %v1803_v0  ;;  %v794_v21 = vpop.f32.mrb[19].mxu1 }
 0x1fe   : > { %v844_v22 = vmul.f32 0.2, %v791_v16  ;;  %v795_v23 = vadd.f32 %v794_v21, %v1805_v1  ;;  %1098 = vmatprep.mubr.bf16.mxu0 %v898_v18 }
 0x1ff   : > { %v845_v24 = vmul.f32 0.2, %v793_v20  ;;  %1099 = vmatmul.mubr.bf16.gmra.mrb[28].mxu0 %v897_v15  ;;  %v875_v26 = vmax.f32 %v789_v13, %v843_v19 }
 0x200   : > { %v846_v25 = vmul.f32 0.2, %v795_v23  ;;  %v876_v28 = vmax.f32 %v791_v16, %v844_v22 }
 0x201   : > { %v877_v27 = vmax.f32 %v793_v20, %v845_v24 }
 0x202   : > { %v878_v29 = vmax.f32 %v795_v23, %v846_v25  ;;  %v798_v30 = vpop.f32.mrb[20].mxu1 }
 0x203   : > { %v799_v31 = vadd.f32 %v798_v30, %v1803_v0  ;;  %v800_v32 = vpop.f32.mrb[21].mxu1  ;;  %v899_v34 = vpack.c.bf16 %v877_v27, %v875_v26  ;;  %v1565_v26 = vmov 0.0   ;;  %v1844_v27 = vld [vmem:[%s1888_s6] ss:$0 sm:$0xff] }
 0x204   : > { %v801_v35 = vadd.f32 %v800_v32, %v1805_v1  ;;  %v802_v36 = vpop.f32.mrb[22].mxu1  ;;  %v900_v37 = vpack.c.bf16 %v878_v29, %v876_v28  ;;  %1464 = vmatprep.subr.bf16.mxu1 %v1565_v26  ;;  %1480 = vmatprep.mubr.msk.bf16.mxu1 %vm1566_vm0, %v1565_v26 }
 0x205   : > { %v847_v38 = vmul.f32 0.2, %v799_v31  ;;  %v803_v39 = vadd.f32 %v802_v36, %v1803_v0  ;;  %v804_v40 = vpop.f32.mrb[23].mxu1 }
 0x206   : > { %v848_v41 = vmul.f32 0.2, %v801_v35  ;;  %v805_v42 = vadd.f32 %v804_v40, %v1805_v1  ;;  %1106 = vmatprep.mubr.bf16.mxu0 %v900_v37 }
 0x207   : > { %v849_v43 = vmul.f32 0.2, %v803_v39  ;;  %1107 = vmatmul.mubr.bf16.gmra.mrb[32].mxu0 %v899_v34  ;;  %v879_v46 = vmax.f32 %v799_v31, %v847_v38 }
 0x208   : > { %v850_v45 = vmul.f32 0.2, %v805_v42  ;;  %v880_v48 = vmax.f32 %v801_v35, %v848_v41 }
 0x209   : > { %v881_v47 = vmax.f32 %v803_v39, %v849_v43 }
 0x20a   : > { %v882_v49 = vmax.f32 %v805_v42, %v850_v45  ;;  %v808_v50 = vpop.f32.mrb[24].mxu1 }
 0x20b   : > { %v809_v51 = vadd.f32 %v808_v50, %v1803_v0  ;;  %v810_v52 = vpop.f32.mrb[25].mxu1  ;;  %v901_v53 = vpack.c.bf16 %v881_v47, %v879_v46 }
 0x20c   : > { %v811_v54 = vadd.f32 %v810_v52, %v1805_v1  ;;  %v812_v44 = vpop.f32.mrb[26].mxu1  ;;  %v902_v55 = vpack.c.bf16 %v882_v49, %v880_v48 }
 0x20d   : > { %v851_v56 = vmul.f32 0.2, %v809_v51  ;;  %v813_v57 = vadd.f32 %v812_v44, %v1803_v0  ;;  %v814_v33 = vpop.f32.mrb[27].mxu1 }
 0x20e   : > { %v852_v58 = vmul.f32 0.2, %v811_v54  ;;  %v815_v59 = vadd.f32 %v814_v33, %v1805_v1  ;;  %1114 = vmatprep.mubr.bf16.mxu0 %v902_v55 }
 0x20f   : > { %v853_v62 = vmul.f32 0.2, %v813_v57  ;;  %1115 = vmatmul.mubr.bf16.gmra.mrb[36].mxu0 %v901_v53  ;;  %v883_v2 = vmax.f32 %v809_v51, %v851_v56 }
 0x210   : > { %v854_v63 = vmul.f32 0.2, %v815_v59  ;;  %v884_v4 = vmax.f32 %v811_v54, %v852_v58 }
 0x211   : > { %v885_v3 = vmax.f32 %v813_v57, %v853_v62 }
 0x212   : > { %v886_v5 = vmax.f32 %v815_v59, %v854_v63  ;;  %v818_v6 = vpop.f32.mrb[28].mxu1 }
 0x213   : > { %v819_v7 = vadd.f32 %v818_v6, %v1803_v0  ;;  %v820_v8 = vpop.f32.mrb[29].mxu1  ;;  %v903_v9 = vpack.c.bf16 %v885_v3, %v883_v2 }
 0x214   : > { %v821_v10 = vadd.f32 %v820_v8, %v1805_v1  ;;  %v822_v11 = vpop.f32.mrb[30].mxu1  ;;  %v904_v12 = vpack.c.bf16 %v886_v5, %v884_v4 }
 0x215   : > { %v855_v13 = vmul.f32 0.2, %v819_v7  ;;  %v823_v14 = vadd.f32 %v822_v11, %v1803_v0  ;;  %v824_v15 = vpop.f32.mrb[31].mxu1  ;;  %v1180_v0 = vld [vmem:[#allocation2] sm:$0x1] }
 0x216   : > { %v856_v16 = vmul.f32 0.2, %v821_v10  ;;  %v825_v17 = vadd.f32 %v824_v15, %v1805_v1  ;;  %1122 = vmatprep.mubr.bf16.mxu0 %v904_v12  ;;  %1183 = vperm.xlu0 %1495, %v1180_v0  }
 0x217   : > { %v857_v18 = vmul.f32 0.2, %v823_v14  ;;  %1123 = vmatmul.mubr.bf16.gmra.mrb[40].mxu0 %v903_v9  ;;  %v887_v20 = vmax.f32 %v819_v7, %v855_v13 }
 0x218   : > { %v858_v19 = vmul.f32 0.2, %v825_v17  ;;  %v888_v22 = vmax.f32 %v821_v10, %v856_v16 }
 0x219   : > { %v889_v21 = vmax.f32 %v823_v14, %v857_v18 }
 0x21a   : > { %v890_v23 = vmax.f32 %v825_v17, %v858_v19 }
 0x21b   : > { %v905_v24 = vpack.c.bf16 %v889_v21, %v887_v20 }
 0x21c   : > { %v906_v25 = vpack.c.bf16 %v890_v23, %v888_v22 }
 0x21e   : > { %1130 = vmatprep.mubr.bf16.mxu0 %v906_v25 }
 0x21f   : > { %1131 = vmatmul.mubr.bf16.gmra.mrb[44].mxu0 %v905_v24 }
 0x2ba   : > { %v1375_v1 = vpop.f32.mrb[16].mxu0 }
 0x2bb   : > { %v1376_v28 = vpop.f32.mrb[17].mxu0 }
 0x2bc   : > { %v1377_v29 = vadd.f32 %v1376_v28, %v1375_v1  ;;  %v1378_v30 = vpop.f32.mrb[18].mxu0 }
 0x2bd   : > { %v1379_v31 = vpop.f32.mrb[19].mxu0 }
 0x2be   : > { %v1077_v32 = vadd.f32 %v1377_v29, %v1844_v27  ;;  %v1380_v34 = vadd.f32 %v1379_v31, %v1378_v30 }
 0x2c0   : > { %v1139_v35 = vmul.f32 0.2, %v1077_v32  ;;  %v1080_v36 = vadd.f32 %v1380_v34, %v1844_v27 }
 0x2c2   : > { %v1140_v37 = vmul.f32 0.2, %v1080_v36  ;;  %v1381_v38 = vpop.f32.mrb[20].mxu0  ;;  %v1155_v40 = vmax.f32 %v1077_v32, %v1139_v35 }
 0x2c3   : > { %v1382_v39 = vpop.f32.mrb[21].mxu0 }
 0x2c4   : > { %v1156_v41 = vmax.f32 %v1080_v36, %v1140_v37  ;;  %v1383_v42 = vadd.f32 %v1382_v39, %v1381_v38  ;;  %v1384_v43 = vpop.f32.mrb[22].mxu0 }
 0x2c5   : > { %v1385_v45 = vpop.f32.mrb[23].mxu0 }
 0x2c6   : > { %v1171_v46 = vpack.c.bf16 %v1156_v41, %v1155_v40  ;;  %v1085_v47 = vadd.f32 %v1383_v42, %v1844_v27  ;;  %v1386_v48 = vadd.f32 %v1385_v45, %v1384_v43 }
 0x2c8   : > { %v1141_v49 = vmul.f32 0.2, %v1085_v47  ;;  %v1088_v50 = vadd.f32 %v1386_v48, %v1844_v27  ;;  %1465 = vmatpush3.bf16.xpose.msra.mxu1 %v1171_v46 }
 0x2c9   : > { %1466 = vmatprep.subr.bf16.mxu1 %v1565_v26 }
 0x2ca   : > { %v1142_v51 = vmul.f32 0.2, %v1088_v50  ;;  %v1387_v52 = vpop.f32.mrb[24].mxu0  ;;  %v1157_v54 = vmax.f32 %v1085_v47, %v1141_v49 }
 0x2cb   : > { %v1388_v53 = vpop.f32.mrb[25].mxu0 }
 0x2cc   : > { %v1158_v44 = vmax.f32 %v1088_v50, %v1142_v51  ;;  %v1389_v55 = vadd.f32 %v1388_v53, %v1387_v52  ;;  %v1390_v56 = vpop.f32.mrb[26].mxu0 }
 0x2cd   : > { %v1391_v57 = vpop.f32.mrb[27].mxu0 }
 0x2ce   : > { %v1172_v33 = vpack.c.bf16 %v1158_v44, %v1157_v54  ;;  %v1093_v58 = vadd.f32 %v1389_v55, %v1844_v27  ;;  %v1392_v59 = vadd.f32 %v1391_v57, %v1390_v56 }
 0x2d0   : > { %v1143_v62 = vmul.f32 0.2, %v1093_v58  ;;  %v1096_v63 = vadd.f32 %v1392_v59, %v1844_v27  ;;  %1467 = vmatpush3.bf16.xpose.msra.mxu1 %v1172_v33 }
 0x2d1   : > { %1468 = vmatprep.subr.bf16.mxu1 %v1565_v26 }
 0x2d2   : > { %v1144_v2 = vmul.f32 0.2, %v1096_v63  ;;  %v1393_v3 = vpop.f32.mrb[28].mxu0  ;;  %v1159_v5 = vmax.f32 %v1093_v58, %v1143_v62 }
 0x2d3   : > { %v1394_v4 = vpop.f32.mrb[29].mxu0 }
 0x2d4   : > { %v1160_v6 = vmax.f32 %v1096_v63, %v1144_v2  ;;  %v1395_v7 = vadd.f32 %v1394_v4, %v1393_v3  ;;  %v1396_v8 = vpop.f32.mrb[30].mxu0 }
 0x2d5   : > { %v1397_v9 = vpop.f32.mrb[31].mxu0 }
 0x2d6   : > { %v1173_v10 = vpack.c.bf16 %v1160_v6, %v1159_v5  ;;  %v1101_v11 = vadd.f32 %v1395_v7, %v1844_v27  ;;  %v1398_v12 = vadd.f32 %v1397_v9, %v1396_v8 }
 0x2d8   : > { %v1145_v13 = vmul.f32 0.2, %v1101_v11  ;;  %v1104_v14 = vadd.f32 %v1398_v12, %v1844_v27  ;;  %1469 = vmatpush3.bf16.xpose.msra.mxu1 %v1173_v10  ;;  %v1184_v12 = vpop.permute.xlu0 %1183 }
 0x2d9   : > { %1470 = vmatprep.subr.bf16.mxu1 %v1565_v26 }
 0x2da   : > { %v1146_v15 = vmul.f32 0.2, %v1104_v14  ;;  %v1399_v16 = vpop.f32.mrb[32].mxu0  ;;  %v1161_v18 = vmax.f32 %v1101_v11, %v1145_v13  ;;  %v1179_v11 = vld [vmem:[%s1889_s7] sm:$0x1]  ;;  %v1189_v13 = vrot.slane %v1184_v12, %v626_v61 }
 0x2db   : > { %v1400_v17 = vpop.f32.mrb[33].mxu0 }
 0x2dc   : > { %v1162_v19 = vmax.f32 %v1104_v14, %v1146_v15  ;;  %v1401_v20 = vadd.f32 %v1400_v17, %v1399_v16  ;;  %v1402_v21 = vpop.f32.mrb[34].mxu0 }
 0x2dd   : > { %v1403_v22 = vpop.f32.mrb[35].mxu0 }
 0x2de   : > { %v1174_v23 = vpack.c.bf16 %v1162_v19, %v1161_v18  ;;  %v1109_v24 = vadd.f32 %v1401_v20, %v1844_v27  ;;  %v1404_v25 = vadd.f32 %v1403_v22, %v1402_v21 }
 0x2e0   : > { %v1147_v0 = vmul.f32 0.2, %v1109_v24  ;;  %v1112_v1 = vadd.f32 %v1404_v25, %v1844_v27  ;;  %1471 = vmatpush3.bf16.xpose.msra.mxu1 %v1174_v23 }
 0x2e1   : > { %1472 = vmatprep.subr.bf16.mxu1 %v1565_v26 }
 0x2e2   : > { %v1148_v28 = vmul.f32 0.2, %v1112_v1  ;;  %v1405_v29 = vpop.f32.mrb[36].mxu0  ;;  %v1163_v31 = vmax.f32 %v1109_v24, %v1147_v0 }
 0x2e3   : > { %v1406_v30 = vpop.f32.mrb[37].mxu0 }
 0x2e4   : > { %v1164_v32 = vmax.f32 %v1112_v1, %v1148_v28  ;;  %v1407_v34 = vadd.f32 %v1406_v30, %v1405_v29  ;;  %v1408_v35 = vpop.f32.mrb[38].mxu0 }
 0x2e5   : > { %v1409_v36 = vpop.f32.mrb[39].mxu0 }
 0x2e6   : > { %v1175_v37 = vpack.c.bf16 %v1164_v32, %v1163_v31  ;;  %v1117_v38 = vadd.f32 %v1407_v34, %v1844_v27  ;;  %v1410_v39 = vadd.f32 %v1409_v36, %v1408_v35 }
 0x2e8   : > { %v1149_v40 = vmul.f32 0.2, %v1117_v38  ;;  %v1120_v41 = vadd.f32 %v1410_v39, %v1844_v27  ;;  %1473 = vmatpush3.bf16.xpose.msra.mxu1 %v1175_v37 }
 0x2e9   : > { %1474 = vmatprep.subr.bf16.mxu1 %v1565_v26 }
 0x2ea   : > { %v1150_v42 = vmul.f32 0.2, %v1120_v41  ;;  %v1411_v43 = vpop.f32.mrb[40].mxu0  ;;  %v1165_v46 = vmax.f32 %v1117_v38, %v1149_v40 }
 0x2eb   : > { %v1412_v45 = vpop.f32.mrb[41].mxu0 }
 0x2ec   : > { %v1166_v47 = vmax.f32 %v1120_v41, %v1150_v42  ;;  %v1413_v48 = vadd.f32 %v1412_v45, %v1411_v43  ;;  %v1414_v49 = vpop.f32.mrb[42].mxu0 }
 0x2ed   : > { %v1415_v50 = vpop.f32.mrb[43].mxu0 }
 0x2ee   : > { %v1176_v51 = vpack.c.bf16 %v1166_v47, %v1165_v46  ;;  %v1125_v52 = vadd.f32 %v1413_v48, %v1844_v27  ;;  %v1416_v53 = vadd.f32 %v1415_v50, %v1414_v49 }
 0x2f0   : > { %v1151_v54 = vmul.f32 0.2, %v1125_v52  ;;  %v1128_v44 = vadd.f32 %v1416_v53, %v1844_v27  ;;  %1475 = vmatpush3.bf16.xpose.msra.mxu1 %v1176_v51 }
 0x2f1   : > { %1476 = vmatprep.subr.bf16.mxu1 %v1565_v26 }
 0x2f2   : > { %v1152_v55 = vmul.f32 0.2, %v1128_v44  ;;  %v1417_v56 = vpop.f32.mrb[44].mxu0  ;;  %v1167_v33 = vmax.f32 %v1125_v52, %v1151_v54 }
 0x2f3   : > { %v1418_v57 = vpop.f32.mrb[45].mxu0 }
 0x2f4   : > { %v1168_v58 = vmax.f32 %v1128_v44, %v1152_v55  ;;  %v1419_v59 = vadd.f32 %v1418_v57, %v1417_v56  ;;  %v1420_v62 = vpop.f32.mrb[46].mxu0 }
 0x2f5   : > { %v1421_v63 = vpop.f32.mrb[47].mxu0 }
 0x2f6   : > { %v1177_v2 = vpack.c.bf16 %v1168_v58, %v1167_v33  ;;  %v1133_v3 = vadd.f32 %v1419_v59, %v1844_v27  ;;  %v1422_v4 = vadd.f32 %v1421_v63, %v1420_v62 }
 0x2f8   : > { %v1153_v5 = vmul.f32 0.2, %v1133_v3  ;;  %v1136_v6 = vadd.f32 %v1422_v4, %v1844_v27  ;;  %1477 = vmatpush3.bf16.xpose.msra.mxu1 %v1177_v2 }
 0x2f9   : > { %1478 = vmatprep.subr.bf16.mxu1 %v1565_v26 }
 0x2fa   : > { %v1154_v7 = vmul.f32 0.2, %v1136_v6  ;;  %v1169_v8 = vmax.f32 %v1133_v3, %v1153_v5 }
 0x2fc   : > { %v1170_v9 = vmax.f32 %v1136_v6, %v1154_v7 }
 0x2fe   : > { %v1178_v10 = vpack.c.bf16 %v1170_v9, %v1169_v8 }
 0x300   : > { %1479 = vmatpush3.bf16.xpose.msra.mxu1 %v1178_v10 }
 0x307   : > { %1481 = vmatmul.mubr.bf16.vlgmr.msra.gmra.mrb[32].mxu1 %v1179_v11 }
 0x3da   : > { %v1224_v27 = vpop.f32.mrb[32].mxu1 }
 0x3db   : > { %v1225_v14 = vadd.f32 %v1224_v27, %v1189_v13  ;;  %v1482_v15 = vpop.f32.mrb[33].mxu1 }
 0x3dc   : > { %v1227_v26 = vpop.f32.mrb[34].mxu1 }
 0x3dd   : > { %v1230_v16 = vsub.f32 0.0, %v1225_v14  ;;  %v1483_v17 = vpop.f32.mrb[35].mxu1 }
 0x3df   : > { %v1231_v18 = vmul.f32 1.442695, %v1230_v16 }
 0x3e1   : > { %1552 = vpow2.f32 %v1231_v18 }
 0x3eb   : > { %v1553_v19 = vpop.eup %1552 }
 0x3ec   : > { %v1233_v20 = vadd.f32 1.0, %v1553_v19 }
 0x3ee   : > { %1554 = vrcp.f32 %v1233_v20 }
 0x3f8   : > { %v1555_v21 = vpop.eup %1554 }
 0x3f9   : > { %1236 = vst [vmem:[%s332_s28] sm:$0x1] %v1555_v21 }
 0x3fa PF: > { %s21_s11 = sadd.s32 1, %s1562_s11  }
 0x3fb   : > { %p18_p5 = scmp.ge.s32.totalorder %s21_s11, 5  }
 0x3fd   :  { %20 = sbr.rel (!%p18_p5) target bundleno = 3 (0x3), region = 86 }

</bundles_post_ra>
